<compile_context>
chip_gen: v7x
topology: tpu7x:2x2x1
jax: 0.10.0
libtpu: 0.0.40
codegen_flags: <defaults>
</compile_context>

<pallas_src>
import math

import jax
import jax.numpy as jnp
from jax import lax
from jax.experimental import pallas as pl
from jax.experimental.pallas import tpu as pltpu

KSIZE = 7           # kernel_size
PAD = 3             # padding
AMOUNT = 1.0        # amount
THRESHOLD = 0.0     # threshold (0 -> branch disabled, matching the default)
LEAKY_SLOPE = 0.01  # ABN default activation parameter
BN_EPS = 1e-5

assert KSIZE == 2 * PAD + 1 and PAD == 3, "shift tree below is specialized to 7x7"


def _round_up(x, m):
    return (x + m - 1) // m * m


def _largest_divisor_leq(n, cap):
    best = 1
    for d in range(1, min(n, cap) + 1):
        if n % d == 0:
            best = d
    return best


def _vmem_capacity_bytes():
    """Physical VMEM of this part; conservative 64 MiB (v7x) fallback."""
    try:
        info = pltpu.get_tpu_info()
        for attr in ("vmem_capacity_bytes", "vmem_bytes", "vmem_size_bytes"):
            v = getattr(info, attr, None)
            if v:
                return int(v)
    except Exception:
        pass
    return 64 * 1024 * 1024


def _step_vmem_bytes(pb, lb, H, W, Hp, Wp, itemsize):
    """Per-grid-step VMEM estimate (double-buffered IO + scratch + live values)."""
    sb = pb // lb
    io = 4 * pb * H * W * itemsize          # 2x-buffered input + output blocks
    abn = pb * H * W * 4                    # f32 ABN intermediate
    stage = pb * Hp * Wp * 4                # staging scratch
    live = (pb + 3 * sb) * Hp * Wp * 4      # staged value + packed temporaries
    return io + abn + stage + live


def _pick_pb(P, H, W, Hp, Wp, lb_max, itemsize, budget_bytes, max_pb=256):
    """Planes per step.  Prefer high lane packing, then big blocks, subject to
    the VMEM budget and keeping >= 2 grid steps (v7x megacore)."""
    best_pb, best_lb = 1, 1
    for pb in range(1, min(P, max_pb) + 1):
        if P % pb:
            continue
        if P >= 2 and P // pb < 2:
            continue                         # keep both v7x TensorCores busy
        lb = _largest_divisor_leq(pb, lb_max)
        if _step_vmem_bytes(pb, lb, H, W, Hp, Wp, itemsize) > budget_bytes:
            continue
        if (lb, pb) > (best_lb, best_pb):
            best_pb, best_lb = pb, lb
    return best_pb, best_lb


def _make_usm_kernel(PB, SB, LB, H, W, Hp, Wp, SW, out_dtype):
    n_lane = Wp
    n_sub = SB * Hp
    inv_area = 1.0 / float(KSIZE * KSIZE)

    def kernel(scale_ref, bias_ref, x_ref, o_ref, stg_ref):
        # scale_ref / bias_ref : (P, 1, 1) f32, resident in VMEM for the whole
        #                        call (constant index_map -> DMA'd once).
        # x_ref / o_ref        : (PB, H, W) blocks.
        # stg_ref              : (PB, Hp, Wp) f32 staging scratch.
        c0 = pl.multiple_of(pl.program_id(0) * PB, PB)
        scale = scale_ref[pl.ds(c0, PB)]                     # (PB, 1, 1)
        bias = bias_ref[pl.ds(c0, PB)]

        # --- ABN (folded inference BN + LeakyReLU), fused with the copy-in ---
        y = x_ref[...].astype(jnp.float32) * scale + bias
        y = jnp.where(y >= 0.0, y, LEAKY_SLOPE * y)

        # --- copy-in + margin-only zeroing.  Interior rows are fully
        #     overwritten every step; lanes >= W are masked on read, so the
        #     old full-buffer zero fill is not needed. ---
        stg_ref[:, 0:H, 0:W] = y
        stg_ref[:, H:Hp, :] = jnp.zeros((PB, Hp - H, Wp), jnp.float32)

        # --- single read; NaN-safe mask of the never-written lanes >= W ---
        lane = lax.broadcasted_iota(jnp.int32, (1, Wp), 1)
        st = stg_ref[...].reshape(PB * Hp, Wp)               # free retiling reshape
        st = jnp.where(lane < W, st, 0.0)

        # --- pack LB planes side-by-side along lanes (slab stride SW = W+PAD).
        #     Plane q = j*SB + i lands at rows [i*Hp, i*Hp+H), lanes
        #     [j*SW, j*SW+W), with >= PAD zero gutters on every side; circular
        #     wrap-around also lands in a zero gutter, so plain circular rolls
        #     reproduce zero padding (count_include_pad=True) exactly. ---
        p = st[0:n_sub, :]
        for j in range(1, LB):
            p = p + pltpu.roll(st[j * n_sub:(j + 1) * n_sub, :],
                               shift=j * SW, axis=1)

        # --- 7-tap separable box sum via a shift tree (3 rolls + 4 VALU/axis) ---
        def box7(v, axis, n):
            t1 = v + pltpu.roll(v, shift=n - 1, axis=axis)        # v[j] + v[j+1]
            t2 = t1 + pltpu.roll(t1, shift=n - 2, axis=axis)      # v[j .. j+3]
            return pltpu.roll(t2, shift=PAD, axis=axis) + t2 - v  # v[j-3 .. j+3]

        box = box7(box7(p, axis=1, n=n_lane), axis=0, n=n_sub)

        # --- unsharp mask (avg = box/49 folded into the amount constant) ---
        sharp = p * (AMOUNT + 1.0) - box * (AMOUNT * inv_area)
        if THRESHOLD > 0:
            blurred = box * inv_area
            sharp = jnp.where(jnp.abs(p - blurred) < THRESHOLD, sharp, p)

        # --- unpack: one lane roll per slab, then a single (SB, H, W) store ---
        for j in range(LB):
            u = sharp if j == 0 else pltpu.roll(
                sharp, shift=(Wp - j * SW) % Wp, axis=1)
            u = u.reshape(SB, Hp, Wp)
            o_ref[j * SB:(j + 1) * SB] = u[:, 0:H, 0:W].astype(out_dtype)

    return kernel


def unsharp_mask_v2(x, gamma, beta, running_mean, running_var, eps=BN_EPS):
    """x: (N, C, H, W). BN params: (C,). Returns (N, C, H, W)."""
    N, C, H, W = x.shape
    P = N * C

    Hp = _round_up(H + PAD, 8)                   # per-plane padded rows (sublanes)
    Wp = max(128, _round_up(W + PAD, 128))       # lane extent of the packed buffer
    SW = W + PAD                                 # lane slab stride (data + gutter)
    lb_max = max(1, Wp // SW)                    # max planes packed per lane row

    # Invariants the zero-gutter / circular-roll trick relies on.
    assert Hp % 8 == 0 and Wp % 128 == 0
    assert Hp - H >= PAD and SW - W >= PAD and lb_max * SW <= Wp

    cap = _vmem_capacity_bytes()
    budget = min(cap // 2, 64 * 1024 * 1024)     # ~32 MiB on v7x, 64 MiB on v5e/v6e
    PB, LB = _pick_pb(P, H, W, Hp, Wp, lb_max, x.dtype.itemsize, budget)
    SB = PB // LB

    # Fold BN (inference) into per-plane scale / bias, resident in VMEM.
    scale = (gamma / jnp.sqrt(running_var + eps)).astype(jnp.float32)
    bias = (beta - running_mean * scale).astype(jnp.float32)
    scale_p = jnp.tile(scale, (N,)).reshape(P, 1, 1)
    bias_p = jnp.tile(bias, (N,)).reshape(P, 1, 1)

    x_p = x.reshape(P, H, W)
    kernel = _make_usm_kernel(PB, SB, LB, H, W, Hp, Wp, SW, x.dtype)

    grid_spec = pltpu.PrefetchScalarGridSpec(
        num_scalar_prefetch=0,
        grid=(P // PB,),
        in_specs=[
            # Whole scale/bias arrays stay resident (constant index_map ->
            # fetched once; no tiny per-step DMAs).
            pl.BlockSpec((P, 1, 1), lambda c: (0, 0, 0)),
            pl.BlockSpec((P, 1, 1), lambda c: (0, 0, 0)),
            pl.BlockSpec((PB, H, W), lambda c: (c, 0, 0)),
        ],
        out_specs=pl.BlockSpec((PB, H, W), lambda c: (c, 0, 0)),
        scratch_shapes=[pltpu.VMEM((PB, Hp, Wp), jnp.float32)],
    )

    need = _step_vmem_bytes(PB, LB, H, W, Hp, Wp, x.dtype.itemsize) + 4 * P * 4 * 2
    vmem_limit = int(min(max(need * 5 // 4, 32 * 1024 * 1024), int(cap * 0.7)))

    out_p = pl.pallas_call(
        kernel,
        out_shape=jax.ShapeDtypeStruct((P, H, W), x.dtype),
        grid_spec=grid_spec,
        compiler_params=pltpu.CompilerParams(
            dimension_semantics=("parallel",),
            vmem_limit_bytes=vmem_limit),
    )(scale_p, bias_p, x_p)
    return out_p.reshape(N, C, H, W)


def _reference(x, gamma, beta, running_mean, running_var, eps=BN_EPS):
    """Pure-JAX reference matching the PyTorch forward (inference-mode ABN)."""
    scale = gamma / jnp.sqrt(running_var + eps)
    bias = beta - running_mean * scale
    y = x * scale[None, :, None, None] + bias[None, :, None, None]
    y = jnp.where(y >= 0, y, LEAKY_SLOPE * y)
    summed = lax.reduce_window(
        y, 0.0, lax.add,
        window_dimensions=(1, 1, KSIZE, KSIZE),
        window_strides=(1, 1, 1, 1),
        padding=((0, 0), (0, 0), (PAD, PAD), (PAD, PAD)))
    blurred = summed / float(KSIZE * KSIZE)
    sharpened = y * (AMOUNT + 1.0) - blurred * AMOUNT
    if THRESHOLD > 0:
        sharpened = jnp.where(jnp.abs(y - blurred) < THRESHOLD, sharpened, y)
    return sharpened


if __name__ == "__main__":
    N, C, H, W = 2, 4, 16, 16
    key = jax.random.PRNGKey(0)
    k1, k2, k3, k4, k5 = jax.random.split(key, 5)

    x = jax.random.normal(k1, (N, C, H, W), dtype=jnp.float32)
    # Deterministic synthetic BN parameters (inference-mode running stats).
    gamma = 1.0 + 0.1 * jax.random.normal(k2, (C,), dtype=jnp.float32)
    beta = 0.1 * jax.random.normal(k3, (C,), dtype=jnp.float32)
    running_mean = 0.1 * jax.random.normal(k4, (C,), dtype=jnp.float32)
    running_var = jnp.abs(1.0 + 0.1 * jax.random.normal(k5, (C,), dtype=jnp.float32))

    out = unsharp_mask_v2(x, gamma, beta, running_mean, running_var)
    out = jax.block_until_ready(out)

    ref = _reference(x, gamma, beta, running_mean, running_var)
    assert out.shape == (N, C, H, W) and out.dtype == jnp.float32
    assert jnp.allclose(out, ref, rtol=1e-4, atol=1e-4), (
        float(jnp.max(jnp.abs(out - ref))))

    print("KERNEL_OK")
</pallas_src>

<mosaic_0001>
module attributes {stable_mosaic.version = 11 : i64} {
  func.func @kernel(%arg0: i32, %arg1: memref<8x1x1xf32, #tpu.memory_space<vmem>>, %arg2: memref<8x1x1xf32, #tpu.memory_space<vmem>>, %arg3: memref<4x16x16xf32, #tpu.memory_space<vmem>>, %arg4: memref<4x16x16xf32, #tpu.memory_space<vmem>>, %arg5: memref<4x24x128xf32, #tpu.memory_space<vmem>>) attributes {dimension_semantics = [#tpu.dimension_semantics<parallel>], iteration_bounds = array<i64: 2>, scalar_prefetch = 0 : i64, scratch_operands = 1 : i64, tpu.core_type = #tpu.core_type<tc>, window_params = [{pipeline_mode = #tpu.pipeline_mode<synchronous>, transform_indices = @transform_0, window_bounds = array<i64: 8, 1, 1>}, {pipeline_mode = #tpu.pipeline_mode<synchronous>, transform_indices = @transform_1, window_bounds = array<i64: 8, 1, 1>}, {transform_indices = @transform_2, window_bounds = array<i64: 4, 16, 16>}, {transform_indices = @transform_3, window_bounds = array<i64: 4, 16, 16>}]} {
    %c4_i32 = arith.constant 4 : i32
    %0 = arith.muli %arg0, %c4_i32 : i32
    %1 = tpu.assume_multiple %0, 4 : i32
    %2 = arith.index_cast %1 : i32 to index
    %c0 = arith.constant 0 : index
    %c0_0 = arith.constant 0 : index
    %3 = vector.load %arg1[%2, %c0, %c0_0] : memref<8x1x1xf32, #tpu.memory_space<vmem>>, vector<4x1x1xf32>
    %4 = arith.index_cast %1 : i32 to index
    %c0_1 = arith.constant 0 : index
    %c0_2 = arith.constant 0 : index
    %5 = vector.load %arg2[%4, %c0_1, %c0_2] : memref<8x1x1xf32, #tpu.memory_space<vmem>>, vector<4x1x1xf32>
    %c0_3 = arith.constant 0 : index
    %c0_4 = arith.constant 0 : index
    %c0_5 = arith.constant 0 : index
    %6 = vector.load %arg3[%c0_3, %c0_4, %c0_5] : memref<4x16x16xf32, #tpu.memory_space<vmem>>, vector<4x16x16xf32>
    %7 = vector.broadcast %3 : vector<4x1x1xf32> to vector<4x16x16xf32>
    %8 = arith.mulf %6, %7 : vector<4x16x16xf32>
    %9 = vector.broadcast %5 : vector<4x1x1xf32> to vector<4x16x16xf32>
    %10 = arith.addf %8, %9 : vector<4x16x16xf32>
    %cst = arith.constant 0.000000e+00 : f32
    %11 = vector.broadcast %cst : f32 to vector<4x16x16xf32>
    %12 = arith.cmpf oge, %10, %11 : vector<4x16x16xf32>
    %cst_6 = arith.constant 0.00999999977 : f32
    %13 = vector.broadcast %cst_6 : f32 to vector<4x16x16xf32>
    %14 = arith.mulf %13, %10 : vector<4x16x16xf32>
    %15 = arith.select %12, %10, %14 : vector<4x16x16xi1>, vector<4x16x16xf32>
    %c0_7 = arith.constant 0 : index
    %c0_8 = arith.constant 0 : index
    %c0_9 = arith.constant 0 : index
    %16 = vector.load %arg5[%c0_7, %c0_8, %c0_9] : memref<4x24x128xf32, #tpu.memory_space<vmem>>, vector<4x16x16xf32>
    tpu.vector_store %arg5[%c0_7, %c0_8, %c0_9], %15 {strides = array<i32>} : memref<4x24x128xf32, #tpu.memory_space<vmem>>, vector<4x16x16xf32>,
    %cst_10 = arith.constant 0.000000e+00 : f32
    %17 = vector.broadcast %cst_10 : f32 to vector<4x8x128xf32>
    %c0_11 = arith.constant 0 : index
    %c16 = arith.constant 16 : index
    %c0_12 = arith.constant 0 : index
    %18 = vector.load %arg5[%c0_11, %c16, %c0_12] : memref<4x24x128xf32, #tpu.memory_space<vmem>>, vector<4x8x128xf32>
    tpu.vector_store %arg5[%c0_11, %c16, %c0_12], %17 {strides = array<i32>} : memref<4x24x128xf32, #tpu.memory_space<vmem>>, vector<4x8x128xf32>,
    %19 = tpu.iota {dimensions = array<i32: 1>} : vector<1x128xi32>
    %c0_13 = arith.constant 0 : index
    %c0_14 = arith.constant 0 : index
    %c0_15 = arith.constant 0 : index
    %20 = vector.load %arg5[%c0_13, %c0_14, %c0_15] : memref<4x24x128xf32, #tpu.memory_space<vmem>>, vector<4x24x128xf32>
    %21 = vector.shape_cast %20 : vector<4x24x128xf32> to vector<96x128xf32>
    %c16_i32 = arith.constant 16 : i32
    %22 = vector.broadcast %c16_i32 : i32 to vector<1x128xi32>
    %23 = arith.cmpi slt, %19, %22 : vector<1x128xi32>
    %cst_16 = arith.constant 0.000000e+00 : f32
    %24 = vector.shape_cast %23 : vector<1x128xi1> to vector<1x128xi1>
    %25 = vector.broadcast %24 : vector<1x128xi1> to vector<96x128xi1>
    %26 = vector.broadcast %cst_16 : f32 to vector<96x128xf32>
    %27 = arith.select %25, %21, %26 : vector<96x128xi1>, vector<96x128xf32>
    %28 = vector.extract_strided_slice %27 {offsets = [0, 0], sizes = [24, 128], strides = [1, 1]} : vector<96x128xf32> to vector<24x128xf32>
    %29 = vector.extract_strided_slice %27 {offsets = [24, 0], sizes = [24, 128], strides = [1, 1]} : vector<96x128xf32> to vector<24x128xf32>
    %c19_i32 = arith.constant 19 : i32
    %30 = tpu.dynamic_rotate %29 by %c19_i32 dim 1 : vector<24x128xf32>, i32 -> vector<24x128xf32>
    %31 = arith.addf %28, %30 : vector<24x128xf32>
    %32 = vector.extract_strided_slice %27 {offsets = [48, 0], sizes = [24, 128], strides = [1, 1]} : vector<96x128xf32> to vector<24x128xf32>
    %c38_i32 = arith.constant 38 : i32
    %33 = tpu.dynamic_rotate %32 by %c38_i32 dim 1 : vector<24x128xf32>, i32 -> vector<24x128xf32>
    %34 = arith.addf %31, %33 : vector<24x128xf32>
    %35 = vector.extract_strided_slice %27 {offsets = [72, 0], sizes = [24, 128], strides = [1, 1]} : vector<96x128xf32> to vector<24x128xf32>
    %c57_i32 = arith.constant 57 : i32
    %36 = tpu.dynamic_rotate %35 by %c57_i32 dim 1 : vector<24x128xf32>, i32 -> vector<24x128xf32>
    %37 = arith.addf %34, %36 : vector<24x128xf32>
    %c127_i32 = arith.constant 127 : i32
    %38 = tpu.dynamic_rotate %37 by %c127_i32 dim 1 : vector<24x128xf32>, i32 -> vector<24x128xf32>
    %39 = arith.addf %37, %38 : vector<24x128xf32>
    %c126_i32 = arith.constant 126 : i32
    %40 = tpu.dynamic_rotate %39 by %c126_i32 dim 1 : vector<24x128xf32>, i32 -> vector<24x128xf32>
    %41 = arith.addf %39, %40 : vector<24x128xf32>
    %c3_i32 = arith.constant 3 : i32
    %42 = tpu.dynamic_rotate %41 by %c3_i32 dim 1 : vector<24x128xf32>, i32 -> vector<24x128xf32>
    %43 = arith.addf %42, %41 : vector<24x128xf32>
    %44 = arith.subf %43, %37 : vector<24x128xf32>
    %c23_i32 = arith.constant 23 : i32
    %45 = tpu.dynamic_rotate %44 by %c23_i32 dim 0 : vector<24x128xf32>, i32 -> vector<24x128xf32>
    %46 = arith.addf %44, %45 : vector<24x128xf32>
    %c22_i32 = arith.constant 22 : i32
    %47 = tpu.dynamic_rotate %46 by %c22_i32 dim 0 : vector<24x128xf32>, i32 -> vector<24x128xf32>
    %48 = arith.addf %46, %47 : vector<24x128xf32>
    %c3_i32_17 = arith.constant 3 : i32
    %49 = tpu.dynamic_rotate %48 by %c3_i32_17 dim 0 : vector<24x128xf32>, i32 -> vector<24x128xf32>
    %50 = arith.addf %49, %48 : vector<24x128xf32>
    %51 = arith.subf %50, %44 : vector<24x128xf32>
    %cst_18 = arith.constant 2.000000e+00 : f32
    %52 = vector.broadcast %cst_18 : f32 to vector<24x128xf32>
    %53 = arith.mulf %37, %52 : vector<24x128xf32>
    %cst_19 = arith.constant 0.0204081628 : f32
    %54 = vector.broadcast %cst_19 : f32 to vector<24x128xf32>
    %55 = arith.mulf %51, %54 : vector<24x128xf32>
    %56 = arith.subf %53, %55 : vector<24x128xf32>
    %57 = vector.shape_cast %56 : vector<24x128xf32> to vector<1x24x128xf32>
    %58 = vector.extract_strided_slice %57 {offsets = [0, 0, 0], sizes = [1, 16, 16], strides = [1, 1, 1]} : vector<1x24x128xf32> to vector<1x16x16xf32>
    %c0_20 = arith.constant 0 : index
    %c0_21 = arith.constant 0 : index
    %c0_22 = arith.constant 0 : index
    %59 = vector.load %arg4[%c0_20, %c0_21, %c0_22] : memref<4x16x16xf32, #tpu.memory_space<vmem>>, vector<1x16x16xf32>
    tpu.vector_store %arg4[%c0_20, %c0_21, %c0_22], %58 {strides = array<i32>} : memref<4x16x16xf32, #tpu.memory_space<vmem>>, vector<1x16x16xf32>,
    %c109_i32 = arith.constant 109 : i32
    %60 = tpu.dynamic_rotate %56 by %c109_i32 dim 1 : vector<24x128xf32>, i32 -> vector<24x128xf32>
    %61 = vector.shape_cast %60 : vector<24x128xf32> to vector<1x24x128xf32>
    %62 = vector.extract_strided_slice %61 {offsets = [0, 0, 0], sizes = [1, 16, 16], strides = [1, 1, 1]} : vector<1x24x128xf32> to vector<1x16x16xf32>
    %c1 = arith.constant 1 : index
    %c0_23 = arith.constant 0 : index
    %c0_24 = arith.constant 0 : index
    %63 = vector.load %arg4[%c1, %c0_23, %c0_24] : memref<4x16x16xf32, #tpu.memory_space<vmem>>, vector<1x16x16xf32>
    tpu.vector_store %arg4[%c1, %c0_23, %c0_24], %62 {strides = array<i32>} : memref<4x16x16xf32, #tpu.memory_space<vmem>>, vector<1x16x16xf32>,
    %c90_i32 = arith.constant 90 : i32
    %64 = tpu.dynamic_rotate %56 by %c90_i32 dim 1 : vector<24x128xf32>, i32 -> vector<24x128xf32>
    %65 = vector.shape_cast %64 : vector<24x128xf32> to vector<1x24x128xf32>
    %66 = vector.extract_strided_slice %65 {offsets = [0, 0, 0], sizes = [1, 16, 16], strides = [1, 1, 1]} : vector<1x24x128xf32> to vector<1x16x16xf32>
    %c2 = arith.constant 2 : index
    %c0_25 = arith.constant 0 : index
    %c0_26 = arith.constant 0 : index
    %67 = vector.load %arg4[%c2, %c0_25, %c0_26] : memref<4x16x16xf32, #tpu.memory_space<vmem>>, vector<1x16x16xf32>
    tpu.vector_store %arg4[%c2, %c0_25, %c0_26], %66 {strides = array<i32>} : memref<4x16x16xf32, #tpu.memory_space<vmem>>, vector<1x16x16xf32>,
    %c71_i32 = arith.constant 71 : i32
    %68 = tpu.dynamic_rotate %56 by %c71_i32 dim 1 : vector<24x128xf32>, i32 -> vector<24x128xf32>
    %69 = vector.shape_cast %68 : vector<24x128xf32> to vector<1x24x128xf32>
    %70 = vector.extract_strided_slice %69 {offsets = [0, 0, 0], sizes = [1, 16, 16], strides = [1, 1, 1]} : vector<1x24x128xf32> to vector<1x16x16xf32>
    %c3 = arith.constant 3 : index
    %c0_27 = arith.constant 0 : index
    %c0_28 = arith.constant 0 : index
    %71 = vector.load %arg4[%c3, %c0_27, %c0_28] : memref<4x16x16xf32, #tpu.memory_space<vmem>>, vector<1x16x16xf32>
    tpu.vector_store %arg4[%c3, %c0_27, %c0_28], %70 {strides = array<i32>} : memref<4x16x16xf32, #tpu.memory_space<vmem>>, vector<1x16x16xf32>,
    return
  }
  func.func @transform_0(%arg0: i32) -> (i32, i32, i32) {
    %c0_i32 = arith.constant 0 : i32
    %c0_i32_0 = arith.constant 0 : i32
    %c0_i32_1 = arith.constant 0 : i32
    %c0_i32_2 = arith.constant 0 : i32
    return %c0_i32, %c0_i32_0, %c0_i32_1 : i32, i32, i32
  }
  func.func @transform_1(%arg0: i32) -> (i32, i32, i32) {
    %c0_i32 = arith.constant 0 : i32
    %c0_i32_0 = arith.constant 0 : i32
    %c0_i32_1 = arith.constant 0 : i32
    %c0_i32_2 = arith.constant 0 : i32
    return %c0_i32, %c0_i32_0, %c0_i32_1 : i32, i32, i32
  }
  func.func @transform_2(%arg0: i32) -> (i32, i32, i32) {
    %c0_i32 = arith.constant 0 : i32
    %c0_i32_0 = arith.constant 0 : i32
    %c0_i32_1 = arith.constant 0 : i32
    return %arg0, %c0_i32, %c0_i32_0 : i32, i32, i32
  }
  func.func @transform_3(%arg0: i32) -> (i32, i32, i32) {
    %c0_i32 = arith.constant 0 : i32
    %c0_i32_0 = arith.constant 0 : i32
    %c0_i32_1 = arith.constant 0 : i32
    return %arg0, %c0_i32, %c0_i32_0 : i32, i32, i32
  }
}

</mosaic_0001>

<bundles_post_ra>
// kernel: tpu_custom_call.1
= control target key start
LH: loop header
LB: loop body
LE: loop exit
PB: predicated region body
PF: predicated region fallthrough
CT: control target
= control target key end

     0   :  { %8 = vsyncpa [#allocation4], 0  ;;  %s1049_s0 = inlined_call_operand.vmem [shape: f32[8,1,1], index: 0, kind: input, shape index: {}]   ;;  %s1050_s1 = inlined_call_operand.vmem [shape: f32[8,1,1], index: 1, kind: input, shape index: {}]   ;;  %s1051_s2 = inlined_call_operand.hbm [shape: f32[8,16,16], index: 2, kind: input, shape index: {}]   ;;  %s1052_s3 = inlined_call_operand.hbm [shape: f32[8,16,16], index: 3, kind: output, shape index: {}]  }
   0x1   :  { %10 = vsyncpa [#allocation4 + $0x1], 0 }
   0x2   :  { %11 = vsyncpa [#allocation5], 0 }
   0x3   :  { %13 = vsyncpa [#allocation5 + $0x1], 0  ;;  %s808_s12 = smov 0   ;;  %s810_s13 = smov 0  }
   0x4   :  { %s812_s14 = smov 0   ;;  %s814_s15 = smov 0  }
   0x5 LB: > { %s829_s16 = sadd.s32 4294967295, %s769_s15   ;;  %s575_s17 = sadd.s32 4294967294, %s769_s15   ;;  %s769_s15 = sphi %s814_s15, %s1065_s15   ;;  %s765_s14 = sphi %s812_s14, %s1064_s14   ;;  %s761_s13 = sphi %s810_s13, %s1063_s13   ;;  %s757_s12 = sphi %s808_s12, %s1062_s12  }
   0x6   : > { %s833_s18 = sadd.s32 1, %s769_s15   ;;  %s68_s19 = sadd.s32 1, %s765_s14 }
   0x7   : > { %s65_s20 = ssub.s32 %s769_s15, %s833_s18  ;;  %p75_p0 = scmp.ne.s32.totalorder %s765_s14, %s761_s13 }
   0x8   : > { %p66_p1 = scmp.eq.s32.totalorder %s65_s20, 0  ;;  %p76_p2 = scmp.eq.s32.totalorder %s769_s15, 0 }
   0x9   : > { %p81_p3 = scmp.ne.s32.totalorder %s761_s13, %s757_s12  ;;  %p82_p4 = scmp.eq.s32.totalorder %s829_s16, 0 }
   0xa   : > { %s845_s21 = scalar_select %p66_p1, %s765_s14, %s68_s19  }
   0xb   : > { %p847_p5 = por %p76_p2, %p75_p0  ;;  %p851_p6 = por %p82_p4, %p81_p3 }
   0xc   : > { %p105_p7 = scmp.eq.s32.totalorder %s829_s16, 1  ;;  %p111_p8 = scmp.eq.s32.totalorder %s575_s17, 1 }
   0xd   : > { %p622_p10 = scmp.lt.s32.totalorder %s769_s15, 2  ;;  %s137_s26 = sand.u32 1, %s765_s14  }
   0xe   : > { %p858_p11 = por %p105_p7, %p75_p0  ;;  %p862_p12 = por %p111_p8, %p81_p3 }
   0xf   : > { %s607_s27 = sshll.u32 %s769_s15, 10  ;;  %s578_s28 = sshll.u32 %s137_s26, 6 }
  0x10   : > { %s1056_s24 = scalar_select %p858_p11, 1, 0 }
  0x11   : > { %s1057_s25 = scalar_select %p862_p12, 1, 0 }
  0x12   : > { %s871_s4 = scalar_lea.hbm %s1051_s2, %s607_s27  ;;  %s141_s5 = scalar_lea.vmem [#allocation3], %s578_s28 }
  0x13   : > { %s149_s6 = sshll.u32 %s141_s5, 4  ;;  %p875_p13 = pnand %p622_p10, %p847_p5  ;;  %s879_s6 = int_to_ptr.vmem [resolvable:$true] %s149_s6 }
  0x14   : > { %s881_s8 = scalar_lea.sflag [#allocation4], %s137_s26  ;;  %s673_s9 = scalar_lea.hbm %s871_s4, 1024 }
  0x15   : > { %p674_p0 = scmp.ne.s32.totalorder %s871_s4, %s673_s9  ;;  %p675_p1 = pneg %p875_p13 }
  0x16   : > { %s678_s17 = scalar_lea.hbm %s1051_s2, 2048  ;;  %p679_p4 = scmp.lt.u32.totalorder %s871_s4, %s1051_s2 }
  0x17   : > { %p676_p2 = pnand %p675_p1, %p674_p0  ;;  %p680_p5 = scmp.lt.u32.totalorder %s678_s17, %s673_s9 }
  0x18   : > { %p682_p8 = scmp.lt.u32.totalorder %s673_s9, %s871_s4 }
  0x19   : > { %p677_p3 = pneg %p676_p2  ;;  %p681_p7 = por %p680_p5, %p679_p4 }
  0x1b   : > { %p683_p10 = por %p682_p8, %p681_p7 }
  0x1d   : > { %p684_p9 = pnand %p683_p10, %p677_p3 }
  0x1f   : > { %687 = shalt.err (!%p684_p9)
}
  0x20   : > { %s688_s22 = scalar_lea.vmem %s879_s6, 1024  ;;  %s771_s26 = smov [#allocation3]  }
  0x21   : > { %p689_p0 = scmp.ne.s32.totalorder %s879_s6, %s688_s22  ;;  %s693_s27 = sshll.u32 %s771_s26, 4  ;;  %s694_s27 = int_to_ptr.vmem [resolvable:$false] %s693_s27 }
  0x22   : > { %s695_s28 = scalar_lea.vmem %s694_s27, 2048  ;;  %p696_p11 = scmp.lt.s32.totalorder %s879_s6, %s694_s27 }
  0x23   : > { %p691_p2 = pnand %p689_p0, %p675_p1  ;;  %p697_p4 = scmp.lt.s32.totalorder %s695_s28, %s688_s22 }
  0x25   : > { %p692_p12 = pneg %p691_p2  ;;  %p698_p5 = por %p697_p4, %p696_p11 }
  0x27   : > { %p699_p7 = pnand %p698_p5, %p692_p12 }
  0x29   : > { %702 = shalt.err (!%p699_p7)
}
  0x2a   : > { %s772_s29 = smov 128   ;;  %s773_s30 = smov 8  }
  0x2b   : > { %617 = dma.hbm_to_vmem [thread:$0]  (!%p875_p13), %s871_s4, 1024, %s879_s6, %s881_s8, %s772_s29, %s772_s29, %s773_s30  }
  0x2c   : > { %p582_p9 = scmp.ge.s32.totalorder %s769_s15, 1  ;;  %p157_p1 = scmp.lt.s32.totalorder %s769_s15, 3 }
  0x2e   : > { %p158_p3 = pnand %p582_p9, %p157_p1 }
  0x2f   : > { %s912_s5 = sand.u32 (!%p158_p3), 1, %s761_s13  }
  0x30   : > { %161 = sbr.rel (%p158_p3) target bundleno = 848 (0x350), region = 32  ;;  %s583_s9 = sshll.u32 (!%p158_p3), %s912_s5, 6 }
  0x31   : > { %s164_s10 = scalar_lea.sflag (!%p158_p3), [#allocation4], %s912_s5  ;;  %s918_s11 = scalar_lea.vmem (!%p158_p3), [#allocation3], %s583_s9 }
  0x37   : > { %748 = dma.done.wait (%p851_p6), %s164_s10, 1024  }
  0x38   : > { %750 = vsyncadd (%p851_p6), %s164_s10, 4294966272  ;;  %v774_v0 = vmov 0   ;;  %s585_s4 = sshll.u32 %s829_s16, 2  ;;  %v336_v7 = vlaneseq  ;;  %v775_v11 = vmov 0.0   ;;  %s776_s23 = smov 38   ;;  %v205_v12 = vld [vmem:[%s918_s11 + $0x10] sm:$0xff] }
  0x39   : > { %672 = vset.pattern.permute.xlu1 %v774_v0  ;;  %671 = vset.pattern.permute.xlu0 %v774_v0  ;;  %s198_s8 = scalar_lea.vmem %s1050_s1, %s585_s4  ;;  %s193_s20 = scalar_lea.vmem %s1049_s0, %s585_s4  ;;  %v206_v13 = vld [vmem:[%s918_s11 + $0x18] sm:$0xff]  ;;  %v209_v20 = vld [vmem:[%s918_s11 + $0x30] sm:$0xff]  ;;  %vm323_vm1 = vcmask 130048   ;;  %v207_v23 = vld [vmem:[%s918_s11 + $0x20] sm:$0xff] }
  0x3a   : > { %v591_v1 = vld [vmem:[%s198_s8 + $0x1] ss:$0 sm:$0xff]  ;;  %v589_v3 = vld [vmem:[%s193_s20 + $0x3] ss:$0 sm:$0xff]  ;;  %v588_v4 = vld [vmem:[%s193_s20 + $0x2] ss:$0 sm:$0xff] }
  0x3b   : > { %v587_v2 = vld [vmem:[%s193_s20 + $0x1] ss:$0 sm:$0xff]  ;;  %280 = vperm.xlu1 %672, %v591_v1   ;;  %v593_v5 = vld [vmem:[%s198_s8 + $0x3] ss:$0 sm:$0xff]  ;;  %v592_v6 = vld [vmem:[%s198_s8 + $0x2] ss:$0 sm:$0xff] }
  0x3c   : > { %236 = vperm.xlu0 %671, %v587_v2   ;;  %v590_v8 = vld [vmem:[%s198_s8] ss:$0 sm:$0xff]  ;;  %v932_v10 = vand.u32 127, %v336_v7  ;;  %s777_s22 = smov 19   ;;  %v210_v21 = vld [vmem:[%s918_s11 + $0x38] sm:$0xff]  ;;  %v208_v24 = vld [vmem:[%s918_s11 + $0x28] sm:$0xff] }
  0x3d   : > { %v586_v9 = vld [vmem:[%s193_s20] ss:$0 sm:$0xff]  ;;  %v204_v41 = vld [vmem:[%s918_s11 + $0x8] sm:$0xff]  ;;  %s778_s26 = smov 57   ;;  %s779_s27 = smov 127  }
  0x3e   : > { %vm350_vm0 = vcmp.lt.s32.totalorder %v932_v10, 16  ;;  %v203_v40 = vld [vmem:[%s918_s11] sm:$0xff]  ;;  %s780_s28 = smov 126   ;;  %s781_s29 = smov 3  }
  0x3f   : > { %244 = vperm.xlu1 %672, %v589_v3   ;;  %s782_s30 = smov 109   ;;  %s189_s10 = scalar_lea.vmem [#allocation6], %s583_s9 }
  0x40   : > { %240 = vperm.xlu0 %671, %v588_v4   ;;  %s783_s11 = smov 90   ;;  %s784_s4 = smov 71  }
  0x41   : > { %s609_s9 = sshll.u32 %s829_s16, 10  ;;  %s498_s6 = sshll.u32 %s189_s10, 4  ;;  %s1003_s6 = int_to_ptr.vmem [resolvable:$true] %s498_s6 }
  0x42   : > { %s1001_s17 = scalar_lea.hbm %s1052_s3, %s609_s9  ;;  %s484_s16 = scalar_lea.sflag [#allocation5], %s912_s5 }
  0x43   : > { %288 = vperm.xlu1 %672, %v593_v5   ;;  %s703_s19 = scalar_lea.vmem %s1003_s6, 1024  ;;  %p1059_p11 = scmp.ne.s32.totalorder %s1056_s24, 0 }
  0x44   : > { %284 = vperm.xlu0 %671, %v592_v6   ;;  %p704_p6 = scmp.ne.s32.totalorder %s1003_s6, %s703_s19  ;;  %s785_s20 = smov [#allocation6]  }
  0x46   : > { %p705_p12 = pnand %p704_p6, %p1059_p11 }
  0x47   : > { %276 = vperm.xlu1 %672, %v590_v8  }
  0x48   : > { %232 = vperm.xlu0 %671, %v586_v9   ;;  %p706_p13 = pneg %p705_p12 }
  0x4b   : > { %378 = vrot.lane.b32.xlu1 %v775_v11, %s776_s23 }
  0x4c   : > { %369 = vrot.lane.b32.xlu0 %v775_v11, %s777_s22 }
  0xba   : > { %v281_v14 = vpop.permute.xlu1 %280 }
  0xbb   : > { %v237_v15 = vpop.permute.xlu0 %236 }
  0xbc   : > { %v249_v16 = vmul.f32 %v237_v15, %v205_v12  ;;  %v250_v17 = vmul.f32 %v237_v15, %v206_v13 }
  0xbe   : > { %v293_v18 = vadd.f32 %v281_v14, %v249_v16  ;;  %v294_v19 = vadd.f32 %v281_v14, %v250_v17  ;;  %v245_v22 = vpop.permute.xlu1 %244 }
  0xbf   : > { %v241_v25 = vpop.permute.xlu0 %240  ;;  %v253_v28 = vmul.f32 %v245_v22, %v209_v20  ;;  %v254_v29 = vmul.f32 %v245_v22, %v210_v21 }
  0xc0   : > { %vm301_vm2 = vcmp.ge.f32.partialorder %v293_v18, 0.0  ;;  %vm302_vm3 = vcmp.ge.f32.partialorder %v294_v19, 0.0  ;;  %v309_v26 = vmul.f32 0.01, %v293_v18  ;;  %v310_v27 = vmul.f32 0.01, %v294_v19 }
  0xc1   : > { %v251_v32 = vmul.f32 %v241_v25, %v207_v23  ;;  %v252_v33 = vmul.f32 %v241_v25, %v208_v24 }
  0xc2   : > { %v317_v30 = vsel %vm301_vm2, %v293_v18, %v309_v26  ;;  %v318_v31 = vsel %vm302_vm3, %v294_v19, %v310_v27  ;;  %v289_v34 = vpop.permute.xlu1 %288 }
  0xc3   : > { %326 = vst.msk [vmem:[#allocation2 + $0x18] sm:$0xff] %vm323_vm1, %v317_v30  ;;  %327 = vst.msk [vmem:[#allocation2 + $0x20] sm:$0xff] %vm323_vm1, %v318_v31  ;;  %v285_v35 = vpop.permute.xlu0 %284  ;;  %v297_v36 = vadd.f32 %v289_v34, %v253_v28  ;;  %v298_v37 = vadd.f32 %v289_v34, %v254_v29 }
  0xc4   : > { %v295_v38 = vadd.f32 %v285_v35, %v251_v32  ;;  %v296_v39 = vadd.f32 %v285_v35, %v252_v33 }
  0xc5   : > { %vm305_vm4 = vcmp.ge.f32.partialorder %v297_v36, 0.0  ;;  %vm306_vm5 = vcmp.ge.f32.partialorder %v298_v37, 0.0  ;;  %v313_v42 = vmul.f32 0.01, %v297_v36  ;;  %v314_v43 = vmul.f32 0.01, %v298_v37 }
  0xc6   : > { %vm303_vm6 = vcmp.ge.f32.partialorder %v295_v38, 0.0  ;;  %vm304_vm7 = vcmp.ge.f32.partialorder %v296_v39, 0.0  ;;  %v311_v44 = vmul.f32 0.01, %v295_v38  ;;  %v312_v45 = vmul.f32 0.01, %v296_v39  ;;  %v277_v53 = vpop.permute.xlu1 %276 }
  0xc7   : > { %v233_v46 = vpop.permute.xlu0 %232  ;;  %v321_v47 = vsel %vm305_vm4, %v297_v36, %v313_v42  ;;  %v322_v48 = vsel %vm306_vm5, %v298_v37, %v314_v43 }
  0xc8   : > { %v247_v49 = vmul.f32 %v233_v46, %v203_v40  ;;  %v248_v50 = vmul.f32 %v233_v46, %v204_v41  ;;  %330 = vst.msk [vmem:[#allocation2 + $0x48] sm:$0xff] %vm323_vm1, %v321_v47  ;;  %331 = vst.msk [vmem:[#allocation2 + $0x50] sm:$0xff] %vm323_vm1, %v322_v48  ;;  %v319_v51 = vsel %vm303_vm6, %v295_v38, %v311_v44  ;;  %v426_v44 = vshrl.u32 %v336_v7, 7 }
  0xc9   : > { %v320_v52 = vsel %vm304_vm7, %v296_v39, %v312_v45  ;;  %328 = vst.msk [vmem:[#allocation2 + $0x30] sm:$0xff] %vm323_vm1, %v319_v51 }
  0xca   : > { %329 = vst.msk [vmem:[#allocation2 + $0x38] sm:$0xff] %vm323_vm1, %v320_v52  ;;  %v291_v54 = vadd.f32 %v277_v53, %v247_v49  ;;  %v292_v55 = vadd.f32 %v277_v53, %v248_v50  ;;  %v342_v56 = vld [vmem:[#allocation2 + $0x20] sm:$0xff]  ;;  %v341_v57 = vld [vmem:[#allocation2 + $0x18] sm:$0xff]  ;;  %v379_v9 = vpop.permute.xlu1 %378  ;;  %vm427_vm10 = vcmp.lt.s32.totalorder %v426_v44, 7  ;;  %vm437_vm11 = vcmp.lt.s32.totalorder %v426_v44, 6 }
  0xcb   : > { %v357_v58 = vsel %vm350_vm0, %v342_v56, 0.0  ;;  %v356_v59 = vsel %vm350_vm0, %v341_v57, 0.0  ;;  %v370_v12 = vpop.permute.xlu0 %369  ;;  %vm447_vm12 = vcmp.lt.s32.totalorder %v426_v44, 3 }
  0xcc   : > { %vm299_vm8 = vcmp.ge.f32.partialorder %v291_v54, 0.0  ;;  %vm300_vm9 = vcmp.ge.f32.partialorder %v292_v55, 0.0  ;;  %v307_v60 = vmul.f32 0.01, %v291_v54  ;;  %v308_v61 = vmul.f32 0.01, %v292_v55  ;;  %367 = vrot.lane.b32.xlu1 %v357_v58, %s777_s22  ;;  %365 = vrot.lane.b32.xlu0 %v356_v59, %s777_s22 }
  0xcd   : > { %v382_v28 = vadd.f32 %v379_v9, %v370_v12 }
  0xce   : > { %v315_v62 = vsel %vm299_vm8, %v291_v54, %v307_v60  ;;  %v316_v63 = vsel %vm300_vm9, %v292_v55, %v308_v61 }
  0xcf   : > { %324 = vst.msk [vmem:[#allocation2] sm:$0xff] %vm323_vm1, %v315_v62  ;;  %325 = vst.msk [vmem:[#allocation2 + $0x8] sm:$0xff] %vm323_vm1, %v316_v63  ;;  %v348_v4 = vld [vmem:[#allocation2 + $0x50] sm:$0xff]  ;;  %v347_v5 = vld [vmem:[#allocation2 + $0x48] sm:$0xff] }
  0xd0   : > { %v344_v0 = vld [vmem:[#allocation2 + $0x30] sm:$0xff]  ;;  %v363_v6 = vsel %vm350_vm0, %v348_v4, 0.0  ;;  %v362_v8 = vsel %vm350_vm0, %v347_v5, 0.0 }
  0xd1   : > { %v345_v1 = vld [vmem:[#allocation2 + $0x38] sm:$0xff]  ;;  %v359_v2 = vsel %vm350_vm0, %v344_v0, 0.0 }
  0xd2   : > { %v360_v3 = vsel %vm350_vm0, %v345_v1, 0.0  ;;  %374 = vrot.lane.b32.xlu1 %v359_v2, %s776_s23 }
  0xd3   : > { %376 = vrot.lane.b32.xlu0 %v360_v3, %s776_s23  ;;  %s707_s23 = sshll.u32 %s785_s20, 4  ;;  %s708_s23 = int_to_ptr.vmem [resolvable:$false] %s707_s23 }
  0xd4   : > { %s709_s22 = scalar_lea.vmem %s708_s23, 2048  ;;  %p710_p8 = scmp.lt.s32.totalorder %s1003_s6, %s708_s23 }
  0xd5   : > { %p711_p10 = scmp.lt.s32.totalorder %s709_s22, %s703_s19 }
  0xd6   : > { %385 = vrot.lane.b32.xlu1 %v363_v6, %s778_s26  ;;  %v339_v15 = vld [vmem:[#allocation2 + $0x8] sm:$0xff]  ;;  %v338_v16 = vld [vmem:[#allocation2] sm:$0xff] }
  0xd7   : > { %383 = vrot.lane.b32.xlu0 %v362_v8, %s778_s26  ;;  %v354_v17 = vsel %vm350_vm0, %v339_v15, 0.0  ;;  %v353_v18 = vsel %vm350_vm0, %v338_v16, 0.0  ;;  %p712_p0 = por %p711_p10, %p710_p8 }
  0xd9   : > { %p713_p2 = pnand %p712_p0, %p706_p13 }
  0xdb   : > { %387 = vrot.lane.b32.xlu0 %v775_v11, %s778_s26 }
 0x13e   : > { %v368_v13 = vpop.permute.xlu1 %367  ;;  %v366_v14 = vpop.permute.xlu0 %365 }
 0x13f   : > { %v372_v21 = vadd.f32 %v368_v13, %v354_v17  ;;  %v371_v22 = vadd.f32 %v366_v14, %v353_v18 }
 0x144   : > { %v375_v19 = vpop.permute.xlu1 %374 }
 0x145   : > { %v377_v20 = vpop.permute.xlu0 %376  ;;  %v380_v23 = vadd.f32 %v375_v19, %v371_v22 }
 0x146   : > { %v381_v24 = vadd.f32 %v377_v20, %v372_v21 }
 0x148   : > { %v386_v25 = vpop.permute.xlu1 %385 }
 0x149   : > { %v384_v11 = vpop.permute.xlu0 %383  ;;  %v976_v26 = vadd.f32 %v386_v25, %v381_v24 }
 0x14a   : > { %v978_v27 = vadd.f32 %v384_v11, %v380_v23 }
 0x14b   : > { %394 = vrot.lane.b32.xlu0 %v976_v26, %s779_s27  ;;  %v455_v17 = vmul.f32 2.0, %v976_v26 }
 0x14c   : > { %392 = vrot.lane.b32.xlu1 %v978_v27, %s779_s27  ;;  %v454_v18 = vmul.f32 2.0, %v978_v27 }
 0x14d   : > { %v388_v10 = vpop.permute.xlu0 %387 }
 0x14e   : > { %v391_v29 = vadd.f32 %v388_v10, %v382_v28 }
 0x150   : > { %396 = vrot.lane.b32.xlu1 %v391_v29, %s779_s27 }
 0x1bd   : > { %v395_v31 = vpop.permute.xlu0 %394 }
 0x1be   : > { %v393_v30 = vpop.permute.xlu1 %392  ;;  %v399_v33 = vadd.f32 %v395_v31, %v976_v26 }
 0x1bf   : > { %v398_v32 = vadd.f32 %v393_v30, %v978_v27 }
 0x1c0   : > { %403 = vrot.lane.b32.xlu1 %v399_v33, %s780_s28 }
 0x1c1   : > { %401 = vrot.lane.b32.xlu0 %v398_v32, %s780_s28 }
 0x1c2   : > { %v397_v34 = vpop.permute.xlu1 %396 }
 0x1c3   : > { %v400_v35 = vadd.f32 %v397_v34, %v391_v29 }
 0x1c5   : > { %405 = vrot.lane.b32.xlu0 %v400_v35, %s780_s28 }
 0x232   : > { %v404_v36 = vpop.permute.xlu1 %403 }
 0x233   : > { %v402_v37 = vpop.permute.xlu0 %401  ;;  %v408_v38 = vadd.f32 %v404_v36, %v399_v33 }
 0x234   : > { %v407_v39 = vadd.f32 %v402_v37, %v398_v32 }
 0x235   : > { %412 = vrot.lane.b32.xlu0 %v408_v38, %s781_s29 }
 0x236   : > { %410 = vrot.lane.b32.xlu1 %v407_v39, %s781_s29 }
 0x237   : > { %v406_v40 = vpop.permute.xlu0 %405 }
 0x238   : > { %v409_v41 = vadd.f32 %v406_v40, %v400_v35 }
 0x23a   : > { %414 = vrot.lane.b32.xlu1 %v409_v41, %s781_s29 }
 0x2a7   : > { %v413_v43 = vpop.permute.xlu0 %412 }
 0x2a8   : > { %v411_v42 = vpop.permute.xlu1 %410  ;;  %v417_v46 = vadd.f32 %v413_v43, %v408_v38 }
 0x2a9   : > { %v416_v45 = vadd.f32 %v411_v42, %v407_v39 }
 0x2aa   : > { %v420_v48 = vsub.f32 %v417_v46, %v976_v26 }
 0x2ab   : > { %v419_v47 = vsub.f32 %v416_v45, %v978_v27 }
 0x2ac   : > { %v415_v49 = vpop.permute.xlu1 %414  ;;  %v423_v51 = vrot.slane %v420_v48, 1 }
 0x2ad   : > { %v422_v50 = vrot.slane %v419_v47, 1  ;;  %v418_v52 = vadd.f32 %v415_v49, %v409_v41 }
 0x2af   : > { %v421_v53 = vsub.f32 %v418_v52, %v391_v29  ;;  %v429_v54 = vsel %vm427_vm10, %v422_v50, %v423_v51 }
 0x2b0   : > { %v431_v56 = vadd.f32 %v429_v54, %v419_v47 }
 0x2b1   : > { %v424_v55 = vrot.slane %v421_v53, 1 }
 0x2b2   : > { %v434_v7 = vrot.slane %v431_v56, 2 }
 0x2b3   : > { %v428_v57 = vsel %vm427_vm10, %v423_v51, %v424_v55  ;;  %v430_v58 = vsel %vm427_vm10, %v424_v55, %v422_v50 }
 0x2b4   : > { %v432_v59 = vadd.f32 %v428_v57, %v420_v48  ;;  %v433_v60 = vadd.f32 %v430_v58, %v421_v53 }
 0x2b6   : > { %v435_v61 = vrot.slane %v432_v59, 2  ;;  %v436_v62 = vrot.slane %v433_v60, 2 }
 0x2b8   : > { %v438_v63 = vsel %vm437_vm11, %v435_v61, %v436_v62  ;;  %v439_v0 = vsel %vm437_vm11, %v434_v7, %v435_v61  ;;  %v440_v1 = vsel %vm437_vm11, %v436_v62, %v434_v7 }
 0x2b9   : > { %v441_v2 = vadd.f32 %v439_v0, %v431_v56  ;;  %v442_v3 = vadd.f32 %v438_v63, %v432_v59  ;;  %v443_v4 = vadd.f32 %v440_v1, %v433_v60 }
 0x2bb   : > { %v444_v5 = vrot.slane %v441_v2, 5  ;;  %v445_v6 = vrot.slane %v442_v3, 5  ;;  %v446_v8 = vrot.slane %v443_v4, 5 }
 0x2bd   : > { %v449_v9 = vsel %vm447_vm12, %v446_v8, %v444_v5  ;;  %v448_v12 = vsel %vm447_vm12, %v444_v5, %v445_v6 }
 0x2be   : > { %v450_v13 = vadd.f32 %v449_v9, %v441_v2  ;;  %v451_v14 = vadd.f32 %v448_v12, %v442_v3 }
 0x2c0   : > { %v452_v15 = vsub.f32 %v450_v13, %v419_v47  ;;  %v453_v16 = vsub.f32 %v451_v14, %v420_v48 }
 0x2c2   : > { %v456_v19 = vmul.f32 0.020408163, %v452_v15  ;;  %v457_v20 = vmul.f32 0.020408163, %v453_v16 }
 0x2c4   : > { %v458_v21 = vsub.f32 %v454_v18, %v456_v19  ;;  %v459_v22 = vsub.f32 %v455_v17, %v457_v20 }
 0x2c6   : > { %462 = vrot.lane.b32.xlu0 %v458_v21, %s782_s30  ;;  %460 = vst.msk [vmem:[%s189_s10] sm:$0xff] %vm323_vm1, %v458_v21  ;;  %464 = vrot.lane.b32.xlu1 %v459_v22, %s782_s30  ;;  %461 = vst.msk [vmem:[%s189_s10 + $0x8] sm:$0xff] %vm323_vm1, %v459_v22 }
 0x2ca   : > { %469 = vrot.lane.b32.xlu0 %v458_v21, %s783_s11  ;;  %471 = vrot.lane.b32.xlu1 %v459_v22, %s783_s11 }
 0x2ce   : > { %476 = vrot.lane.b32.xlu0 %v458_v21, %s784_s4  ;;  %478 = vrot.lane.b32.xlu1 %v459_v22, %s784_s4 }
 0x338   : > { %v463_v23 = vpop.permute.xlu0 %462  ;;  %v465_v24 = vpop.permute.xlu1 %464 }
 0x339   : > { %594 = vst.msk [vmem:[%s189_s10 + $0x10] sm:$0xff] %vm323_vm1, %v463_v23  ;;  %595 = vst.msk [vmem:[%s189_s10 + $0x18] sm:$0xff] %vm323_vm1, %v465_v24 }
 0x33c   : > { %v470_v25 = vpop.permute.xlu0 %469  ;;  %v472_v11 = vpop.permute.xlu1 %471 }
 0x33d   : > { %596 = vst.msk [vmem:[%s189_s10 + $0x20] sm:$0xff] %vm323_vm1, %v470_v25  ;;  %597 = vst.msk [vmem:[%s189_s10 + $0x28] sm:$0xff] %vm323_vm1, %v472_v11 }
 0x340   : > { %v477_v26 = vpop.permute.xlu0 %476  ;;  %v479_v27 = vpop.permute.xlu1 %478 }
 0x341   : > { %598 = vst.msk [vmem:[%s189_s10 + $0x30] sm:$0xff] %vm323_vm1, %v477_v26  ;;  %599 = vst.msk [vmem:[%s189_s10 + $0x38] sm:$0xff] %vm323_vm1, %v479_v27 }
 0x342   : > { %716 = shalt.err (!%p713_p2)
}
 0x343   : > { %s717_s26 = scalar_lea.hbm %s1001_s17, 1024  ;;  %s721_s29 = scalar_lea.hbm %s1052_s3, 2048 }
 0x344   : > { %p718_p4 = scmp.ne.s32.totalorder %s1001_s17, %s717_s26  ;;  %p722_p9 = scmp.lt.u32.totalorder %s1001_s17, %s1052_s3 }
 0x345   : > { %p723_p1 = scmp.lt.u32.totalorder %s721_s29, %s717_s26  ;;  %p725_p6 = scmp.lt.u32.totalorder %s717_s26, %s1001_s17 }
 0x346   : > { %p719_p5 = pnand %p718_p4, %p1059_p11 }
 0x347   : > { %p724_p3 = por %p723_p1, %p722_p9 }
 0x348   : > { %p720_p7 = pneg %p719_p5 }
 0x349   : > { %p726_p12 = por %p725_p6, %p724_p3 }
 0x34b   : > { %p727_p13 = pnand %p726_p12, %p720_p7 }
 0x34d   : > { %730 = shalt.err (!%p727_p13)
}
 0x34e   : > { %s786_s11 = smov 128   ;;  %s787_s4 = smov 8  }
 0x34f   : > { %612 = dma.vmem_to_hbm [thread:$0]  (%p1059_p11), %s1003_s6, 1024, %s1001_s17, %s484_s16, %s786_s11, %s786_s11, %s787_s4  }
 0x350 PF: > { %s513_s9 = sand.u32 1, %s757_s12   ;;  %p1060_p8 = scmp.ne.s32.totalorder %s1057_s25, 0 }
 0x351   : > { %p1061_p10 = scmp.ge.s32.totalorder %s769_s15, 2  ;;  %s514_s7 = scalar_lea.sflag [#allocation5], %s513_s9 }
 0x353   : > { %p619_p0 = pnand %p1061_p10, %p1060_p8 }
 0x355   : > { %752 = dma.done.wait (!%p619_p0), %s514_s7, 1024  }
 0x356   : > { %754 = vsyncadd (!%p619_p0), %s514_s7, 4294966272  ;;  %p16_p2 = scmp.ge.s32.totalorder %s833_s18, 4   ;;  %s1062_s12 = smov %s761_s13 }
 0x357   : > { %s1063_s13 = smov %s765_s14  ;;  %s1064_s14 = smov %s845_s21 }
 0x358   : > { %s1065_s15 = smov %s833_s18  ;;  %18 = sbr.rel (!%p16_p2) target bundleno = 5 (0x5), region = 82 }
 0x35f   :  { %519 = vsyncpa [#allocation4], 1 }
 0x360   :  { %521 = vsyncpa [#allocation4 + $0x1], 1 }
 0x361   :  { %522 = vsyncpa [#allocation5], 1 }
 0x362   :  { %524 = vsyncpa [#allocation5 + $0x1], 1 }

</bundles_post_ra>
